<compile_context>
chip_gen: v5e
topology: v5e:2x2
jax: 0.10.0
libtpu: 0.0.40
codegen_flags: <defaults>
</compile_context>

<pallas_src>
import functools

import jax
import jax.numpy as jnp
from jax import lax
from jax.experimental import pallas as pl
from jax.experimental.pallas import tpu as pltpu


# ----------------------------- hardware probing -----------------------------

def _chip_generation():
    """Best-effort TPU generation (0 if unknown)."""
    try:
        kind = jax.devices()[0].device_kind.lower()
    except Exception:
        return 0
    for g in (7, 6, 5, 4):
        if ("v%d" % g) in kind:
            return g
    return 0


def _physical_vmem_bytes(gen):
    """Best-effort per-core physical VMEM capacity."""
    try:
        info = pltpu.get_tpu_info()
        cap = getattr(info, "vmem_capacity_bytes", None)
        if cap:
            return int(cap)
    except Exception:
        pass
    return (64 if gen >= 7 else 128) * 1024 * 1024


def _target_block_bytes(gen):
    # ~4 MiB is at the HBM-roofline plateau; v5e/v6e have 2x v7x's VMEM so we
    # can halve the number of grid steps (per-step issue overhead) there.
    return (4 if gen >= 7 else 8) * 1024 * 1024


def _sublane_rows(itemsize):
    return max(8, 32 // max(1, itemsize))      # 8 for f32, 16 for bf16


def _vmem_needed(rows, H, io_itemsize, gb_rows):
    """Bytes needed: double-buffered in+out I/O blocks, ~3 f32 in-kernel
    temporaries (upcast x, centered / x*x, x_norm), gb block, headroom."""
    io_block = rows * H * io_itemsize
    f32_block = rows * H * 4
    gb_block = gb_rows * 2 * H * 4
    return 4 * io_block + 3 * f32_block + 2 * gb_block + (2 << 20)


# ------------------------------- tile choice ---------------------------------

def _choose_row_tile(N, H, io_itemsize, gen):
    """Row tile for the flattened plain-LN path: ~target-sized block, multiple
    of the sublane pack (or == N), shrunk until it fits the VMEM budget."""
    sub = _sublane_rows(io_itemsize)
    target = _target_block_bytes(gen)
    cap = _physical_vmem_bytes(gen) * 3 // 4
    if N <= sub:
        return int(N)
    rows = max(1, target // max(1, H * io_itemsize))
    rows = max(sub, (rows // sub) * sub)
    rows = min(rows, N)
    while rows > sub and rows != N and _vmem_needed(rows, H, io_itemsize, 0) > cap:
        rows = max(sub, ((rows // 2) // sub) * sub)
    if rows == N and _vmem_needed(rows, H, io_itemsize, 0) > cap and N > sub:
        rows = max(sub, ((N // 2) // sub) * sub)
    return int(rows)


def _choose_ada_tiles(B, T, H, io_itemsize, gen):
    """(batch_tile, seq_tile) for the ada path: ~target-sized (bt, st, H)
    block, blocking batch rows when T is small, shrunk to fit VMEM."""
    sub = _sublane_rows(io_itemsize)
    target = _target_block_bytes(gen)
    cap = _physical_vmem_bytes(gen) * 3 // 4
    row_bytes = H * io_itemsize

    if T * row_bytes >= target or B == 1:
        bt = 1
        st = max(1, target // max(1, row_bytes))
        st = max(sub, (st // sub) * sub)
        st = min(st, T)
        if T <= sub:
            st = T
    else:
        # T small: take the whole sequence and block several batch rows so the
        # DMA tile still hits the target size (keeps per-batch gb residency).
        st = T
        bt = min(B, max(1, target // max(1, T * row_bytes)))

    while _vmem_needed(bt * st, H, io_itemsize, bt) > cap:
        if st != T and st > sub:
            st = max(sub, ((st // 2) // sub) * sub)
        elif st == T and T > sub:
            st = max(sub, ((T // 2) // sub) * sub)
        elif bt > 1:
            bt = max(1, bt // 2)
        else:
            break
    return int(bt), int(st)


# --------------------------------- kernels ----------------------------------

def _ln_normalize(x, eps, single_pass_var):
    # x in f32; LayerNorm over the last axis, no affine.
    mean = jnp.mean(x, axis=-1, keepdims=True)
    if single_pass_var:
        # One traversal of x (E[x^2] - mean^2). Slightly less accurate for
        # offset-heavy inputs; only enabled where the BW/VALU margin is tight.
        var = jnp.maximum(jnp.mean(x * x, axis=-1, keepdims=True) - mean * mean, 0.0)
        return (x - mean) * lax.rsqrt(var + eps)
    centered = x - mean
    var = jnp.mean(centered * centered, axis=-1, keepdims=True)
    return centered * lax.rsqrt(var + eps)


def _ada_ln_kernel(x_ref, gb_ref, o_ref, *, eps, single_pass_var, affine_low):
    # x_ref:  (bt, Tt, H)   current (batch-tile, seq-tile) block
    # gb_ref: (bt, 2, H)    gamma (row 0) / beta (row 1) per batch row
    x = x_ref[...].astype(jnp.float32)
    x_norm = _ln_normalize(x, eps, single_pass_var)

    cdt = o_ref.dtype if affine_low else jnp.float32
    gb = gb_ref[...]
    scale = (gb[:, 0, :].astype(jnp.float32) + 1.0).astype(cdt)   # (bt, H)
    beta = gb[:, 1, :].astype(cdt)                                # (bt, H)

    out = x_norm.astype(cdt) * scale[:, None, :] + beta[:, None, :]
    o_ref[...] = out.astype(o_ref.dtype)


def _plain_ln_kernel(x_ref, o_ref, *, eps, single_pass_var):
    # x_ref: (rows, H) — rows are independent LN instances.
    x = x_ref[...].astype(jnp.float32)
    o_ref[...] = _ln_normalize(x, eps, single_pass_var).astype(o_ref.dtype)


# --------------------------------- wrapper ----------------------------------

def ada_layer_norm(x, gamma_beta=None, *, eps=1e-6, seq_tile=None,
                   batch_tile=None, single_pass_var=None):
    """Pallas TPU AdaLayerNorm.

    x:          (B, T, H)
    gamma_beta: (B, 2*H) or None
    """
    B, T, H = x.shape
    io_itemsize = jnp.dtype(x.dtype).itemsize
    gen = _chip_generation()
    phys = _physical_vmem_bytes(gen)

    if single_pass_var is None:
        single_pass_var = (gen >= 7) or (gen == 6 and x.dtype == jnp.bfloat16)
    affine_low = (x.dtype == jnp.bfloat16) and gen >= 6   # bf16 VPU on v6e/v7x

    # TODO(synk): production shapes should keep H a multiple of 128 for
    # lane-dense stores; padding here would change the LN reduction unless
    # masked, so it is left to the caller.

    if gamma_beta is None:
        # Plain LayerNorm: every (b, t) row is independent, so flatten (B, T)
        # into one row axis and tile that — avoids tiny blocks when T is small.
        N = B * T
        x2 = x.reshape(N, H)
        rows = _choose_row_tile(N, H, io_itemsize, gen)
        if seq_tile is not None:
            rows = int(min(seq_tile, N))
        vmem_limit = int(min(max(_vmem_needed(rows, H, io_itemsize, 0),
                                 32 * 1024 * 1024), phys * 3 // 4))
        kernel = functools.partial(_plain_ln_kernel, eps=eps,
                                   single_pass_var=single_pass_var)
        out2 = pl.pallas_call(
            kernel,
            out_shape=jax.ShapeDtypeStruct((N, H), x.dtype),
            grid_spec=pltpu.PrefetchScalarGridSpec(
                num_scalar_prefetch=0,
                grid=(pl.cdiv(N, rows),),
                in_specs=[pl.BlockSpec((rows, H), lambda i: (i, 0))],
                out_specs=pl.BlockSpec((rows, H), lambda i: (i, 0)),
            ),
            compiler_params=pltpu.CompilerParams(
                dimension_semantics=("parallel",),
                vmem_limit_bytes=vmem_limit,
            ),
        )(x2)
        return out2.reshape(B, T, H)

    assert gamma_beta.shape == (B, 2 * H)
    gb3 = gamma_beta.reshape(B, 2, H)             # gamma row 0, beta row 1

    bt, st = _choose_ada_tiles(B, T, H, io_itemsize, gen)
    if seq_tile is not None:
        st = int(min(seq_tile, T))
    if batch_tile is not None:
        bt = int(min(batch_tile, B))
    vmem_limit = int(min(max(_vmem_needed(bt * st, H, io_itemsize, bt),
                             32 * 1024 * 1024), phys * 3 // 4))

    kernel = functools.partial(_ada_ln_kernel, eps=eps,
                               single_pass_var=single_pass_var,
                               affine_low=affine_low)
    # Batch tiles outer, seq tiles inner: gb block stays resident across t.
    grid = (pl.cdiv(B, bt), pl.cdiv(T, st))
    return pl.pallas_call(
        kernel,
        out_shape=jax.ShapeDtypeStruct((B, T, H), x.dtype),
        grid_spec=pltpu.PrefetchScalarGridSpec(
            num_scalar_prefetch=0,
            grid=grid,
            in_specs=[
                pl.BlockSpec((bt, st, H), lambda b, t: (b, t, 0)),
                pl.BlockSpec((bt, 2, H), lambda b, t: (b, 0, 0)),
            ],
            out_specs=pl.BlockSpec((bt, st, H), lambda b, t: (b, t, 0)),
        ),
        compiler_params=pltpu.CompilerParams(
            dimension_semantics=("parallel", "parallel"),
            vmem_limit_bytes=vmem_limit,
        ),
    )(x, gb3)


# -------------------------------- reference ---------------------------------

def _reference(x, gamma_beta, eps=1e-6):
    xf = x.astype(jnp.float32)
    mean = jnp.mean(xf, axis=-1, keepdims=True)
    var = jnp.mean((xf - mean) ** 2, axis=-1, keepdims=True)
    xn = (xf - mean) / jnp.sqrt(var + eps)
    if gamma_beta is not None:
        H = x.shape[-1]
        gamma = gamma_beta[:, :H][:, None, :].astype(jnp.float32)
        beta = gamma_beta[:, H:][:, None, :].astype(jnp.float32)
        xn = xn * (1.0 + gamma) + beta
    return xn.astype(x.dtype)


if __name__ == "__main__":
    key = jax.random.PRNGKey(0)

    # Small shape consistent with the module: (B, T, H) = (2, 8, 32).
    B, T, H = 2, 8, 32
    kx, kg, kx2, kg2 = jax.random.split(key, 4)
    x = jax.random.normal(kx, (B, T, H), dtype=jnp.float32)
    gamma_beta = jax.random.normal(kg, (B, 2 * H), dtype=jnp.float32) * 0.1

    out = jax.block_until_ready(ada_layer_norm(x, gamma_beta))
    ref = _reference(x, gamma_beta)
    assert out.shape == (B, T, H)
    assert jnp.allclose(out, ref, atol=1e-5, rtol=1e-5), "mismatch vs reference"

    # gamma_beta=None path (flattened (B*T, H) plain LayerNorm).
    out_plain = jax.block_until_ready(ada_layer_norm(x, None))
    ref_plain = _reference(x, None)
    assert jnp.allclose(out_plain, ref_plain, atol=1e-5, rtol=1e-5)

    # Plain path with multiple row tiles over the flattened axis.
    out_plain2 = jax.block_until_ready(ada_layer_norm(x, None, seq_tile=8))
    assert jnp.allclose(out_plain2, ref_plain, atol=1e-5, rtol=1e-5)

    # Multi-tile ada path: lane-dense H=128, explicit (batch_tile, seq_tile)
    # so the grid has several steps on both axes.
    B2, T2, H2 = 2, 24, 128
    x2 = jax.random.normal(kx2, (B2, T2, H2), dtype=jnp.float32)
    gb2 = jax.random.normal(kg2, (B2, 2 * H2), dtype=jnp.float32) * 0.1
    out2 = jax.block_until_ready(
        ada_layer_norm(x2, gb2, seq_tile=8, batch_tile=1))
    ref2 = _reference(x2, gb2)
    assert jnp.allclose(out2, ref2, atol=1e-5, rtol=1e-5), "tiled mismatch"

    # bf16 I/O path (exercises the bf16 affine / single-pass-var gates where
    # the generation enables them); bf16-appropriate tolerance.
    xb = x.astype(jnp.bfloat16)
    gbb = gamma_beta.astype(jnp.bfloat16)
    outb = jax.block_until_ready(ada_layer_norm(xb, gbb))
    refb = _reference(xb, gbb)
    assert jnp.allclose(outb.astype(jnp.float32), refb.astype(jnp.float32),
                        atol=3e-2, rtol=3e-2), "bf16 mismatch"

    print("KERNEL_OK")
</pallas_src>

<mosaic_0001>
module attributes {stable_mosaic.version = 11 : i64} {
  func.func @_ada_ln_kernel(%arg0: i32, %arg1: i32, %arg2: memref<2x8x32xf32, #tpu.memory_space<vmem>>, %arg3: memref<2x2x32xf32, #tpu.memory_space<vmem>>, %arg4: memref<2x8x32xf32, #tpu.memory_space<vmem>>) attributes {dimension_semantics = [#tpu.dimension_semantics<parallel>, #tpu.dimension_semantics<parallel>], iteration_bounds = array<i64: 1, 1>, scalar_prefetch = 0 : i64, scratch_operands = 0 : i64, tpu.core_type = #tpu.core_type<tc>, window_params = [{transform_indices = @transform_0, window_bounds = array<i64: 2, 8, 32>}, {transform_indices = @transform_1, window_bounds = array<i64: 2, 2, 32>}, {transform_indices = @transform_2, window_bounds = array<i64: 2, 8, 32>}]} {
    %c0 = arith.constant 0 : index
    %c0_0 = arith.constant 0 : index
    %c0_1 = arith.constant 0 : index
    %0 = vector.load %arg2[%c0, %c0_0, %c0_1] : memref<2x8x32xf32, #tpu.memory_space<vmem>>, vector<2x8x32xf32>
    %cst = arith.constant dense<0.000000e+00> : vector<2x8xf32>
    %1 = vector.multi_reduction <add>, %0, %cst [2] : vector<2x8x32xf32> to vector<2x8xf32>
    %2 = vector.shape_cast %1 : vector<2x8xf32> to vector<2x8x1xf32>
    %cst_2 = arith.constant 3.200000e+01 : f32
    %3 = vector.broadcast %cst_2 : f32 to vector<2x8x1xf32>
    %4 = arith.divf %2, %3 : vector<2x8x1xf32>
    %5 = vector.broadcast %4 : vector<2x8x1xf32> to vector<2x8x32xf32>
    %6 = arith.subf %0, %5 : vector<2x8x32xf32>
    %7 = arith.mulf %6, %6 : vector<2x8x32xf32>
    %cst_3 = arith.constant dense<0.000000e+00> : vector<2x8xf32>
    %8 = vector.multi_reduction <add>, %7, %cst_3 [2] : vector<2x8x32xf32> to vector<2x8xf32>
    %9 = vector.shape_cast %8 : vector<2x8xf32> to vector<2x8x1xf32>
    %cst_4 = arith.constant 3.200000e+01 : f32
    %10 = vector.broadcast %cst_4 : f32 to vector<2x8x1xf32>
    %11 = arith.divf %9, %10 : vector<2x8x1xf32>
    %cst_5 = arith.constant 9.99999997E-7 : f32
    %12 = vector.broadcast %cst_5 : f32 to vector<2x8x1xf32>
    %13 = arith.addf %11, %12 : vector<2x8x1xf32>
    %14 = math.rsqrt %13 : vector<2x8x1xf32>
    %15 = vector.broadcast %14 : vector<2x8x1xf32> to vector<2x8x32xf32>
    %16 = arith.mulf %6, %15 : vector<2x8x32xf32>
    %c0_6 = arith.constant 0 : index
    %c0_7 = arith.constant 0 : index
    %c0_8 = arith.constant 0 : index
    %17 = vector.load %arg3[%c0_6, %c0_7, %c0_8] : memref<2x2x32xf32, #tpu.memory_space<vmem>>, vector<2x2x32xf32>
    %18 = vector.extract_strided_slice %17 {offsets = [0, 0, 0], sizes = [2, 1, 32], strides = [1, 1, 1]} : vector<2x2x32xf32> to vector<2x1x32xf32>
    %19 = vector.shape_cast %18 : vector<2x1x32xf32> to vector<2x32xf32>
    %cst_9 = arith.constant 1.000000e+00 : f32
    %20 = vector.broadcast %cst_9 : f32 to vector<2x32xf32>
    %21 = arith.addf %19, %20 : vector<2x32xf32>
    %22 = vector.extract_strided_slice %17 {offsets = [0, 1, 0], sizes = [2, 1, 32], strides = [1, 1, 1]} : vector<2x2x32xf32> to vector<2x1x32xf32>
    %23 = vector.shape_cast %22 : vector<2x1x32xf32> to vector<2x32xf32>
    %24 = vector.shape_cast %21 : vector<2x32xf32> to vector<2x1x32xf32>
    %25 = vector.broadcast %24 : vector<2x1x32xf32> to vector<2x8x32xf32>
    %26 = arith.mulf %16, %25 : vector<2x8x32xf32>
    %27 = vector.shape_cast %23 : vector<2x32xf32> to vector<2x1x32xf32>
    %28 = vector.broadcast %27 : vector<2x1x32xf32> to vector<2x8x32xf32>
    %29 = arith.addf %26, %28 : vector<2x8x32xf32>
    %c0_10 = arith.constant 0 : index
    %c0_11 = arith.constant 0 : index
    %c0_12 = arith.constant 0 : index
    %30 = vector.load %arg4[%c0_10, %c0_11, %c0_12] : memref<2x8x32xf32, #tpu.memory_space<vmem>>, vector<2x8x32xf32>
    tpu.vector_store %arg4[%c0_10, %c0_11, %c0_12], %29 {strides = array<i32>} : memref<2x8x32xf32, #tpu.memory_space<vmem>>, vector<2x8x32xf32>,
    return
  }
  func.func @transform_0(%arg0: i32, %arg1: i32) -> (i32, i32, i32) {
    %c0_i32 = arith.constant 0 : i32
    %c0_i32_0 = arith.constant 0 : i32
    return %arg0, %arg1, %c0_i32 : i32, i32, i32
  }
  func.func @transform_1(%arg0: i32, %arg1: i32) -> (i32, i32, i32) {
    %c0_i32 = arith.constant 0 : i32
    %c0_i32_0 = arith.constant 0 : i32
    %c0_i32_1 = arith.constant 0 : i32
    return %arg0, %c0_i32, %c0_i32_0 : i32, i32, i32
  }
  func.func @transform_2(%arg0: i32, %arg1: i32) -> (i32, i32, i32) {
    %c0_i32 = arith.constant 0 : i32
    %c0_i32_0 = arith.constant 0 : i32
    return %arg0, %arg1, %c0_i32 : i32, i32, i32
  }
}

</mosaic_0001>

<bundles_post_ra>
// kernel: tpu_custom_call.1
= control target key start
LH: loop header
LB: loop body
LE: loop exit
PB: predicated region body
PF: predicated region fallthrough
CT: control target
= control target key end

     0   :  { %7 = vsyncpa [#allocation3], 0  ;;  %s268_s0 = inlined_call_operand.hbm [shape: f32[2,8,32], index: 0, kind: input, shape index: {}]   ;;  %s269_s1 = inlined_call_operand.hbm [shape: f32[2,2,32], index: 1, kind: input, shape index: {}]   ;;  %s270_s2 = inlined_call_operand.hbm [shape: f32[2,8,32], index: 2, kind: output, shape index: {}]  }
   0x1   :  { %8 = vsyncpa [#allocation6], 0 }
   0x2   :  { %9 = vsyncpa [#allocation4], 0  ;;  %s14_s11 = sshll.u32 %s268_s0, 4  ;;  %s224_s12 = smov [#allocation2]   ;;  %s15_s11 = int_to_ptr.hbm [resolvable:$true] %s14_s11 }
   0x3   :  { %s16_s13 = sshll.u32 %s224_s12, 4  ;;  %s27_s16 = sshll.u32 %s269_s1, 4  ;;  %s17_s13 = int_to_ptr.vmem [resolvable:$true] %s16_s13  ;;  %s28_s16 = int_to_ptr.hbm [resolvable:$true] %s27_s16 }
   0x4   :  { %s225_s17 = smov 128   ;;  %s226_s18 = smov 8  }
   0x5   :  { %22 = dma.hbm_to_vmem [thread:$0]  %s15_s11, 256, %s17_s13, [#allocation3], %s225_s17, %s225_s17, %s226_s18  }
   0x6   :  { %s227_s19 = smov [#allocation5]   ;;  %s228_s21 = smov 32  }
   0x7   :  { %s29_s20 = sshll.u32 %s227_s19, 4  ;;  %s229_s0 = smov 2   ;;  %s30_s20 = int_to_ptr.vmem [resolvable:$true] %s29_s20 }
   0x8   :  { %35 = dma.hbm_to_vmem [thread:$0]  %s28_s16, 64, %s30_s20, [#allocation6], %s228_s21, %s228_s21, %s229_s0  }
   0x9   :  { %218 = dma.done.wait [#allocation3], 256  }
   0xa   :  { %219 = vsyncadd [#allocation3], 4294967040 }
   0xb   :  { %220 = dma.done.wait [#allocation6], 64  }
   0xc   :  { %221 = vsyncadd [#allocation6], 4294967232  ;;  %vm46_vm0 = vcmask 261120   ;;  %v44_v0 = vld [vmem:[#allocation2] sm:$0xff]  ;;  %v45_v2 = vld [vmem:[#allocation2 + $0x8] sm:$0xff]  ;;  %v230_v4 = vmov 32.0  }
   0xd   :  { %v47_v1 = vsel %vm46_vm0, %v44_v0, 0.0  ;;  %v50_v3 = vsel %vm46_vm0, %v45_v2, 0.0  ;;  %140 = vrcp.f32 %v230_v4  ;;  %v98_v29 = vld [vmem:[#allocation5] sm:$0x3]  ;;  %v99_v39 = vld [vmem:[#allocation5 + $0x2] sm:$0x3] }
   0xe   :  { %48 = vadd.xlane.f32.xlu0 %v47_v1  ;;  %v100_v32 = vadd.f32 1.0, %v98_v29  ;;  %v106_v42 = vperm.slane %v98_v29, 1  ;;  %v101_v45 = vadd.f32 1.0, %v99_v39  ;;  %v107_v52 = vperm.slane %v99_v39, 1  ;;  %s231_s1 = smov [#allocation7]   ;;  %s118_s25 = sshll.u32 %s270_s2, 4  ;;  %s119_s25 = int_to_ptr.hbm [resolvable:$true] %s118_s25 }
   0xf   :  { %s116_s22 = sshll.u32 %s231_s1, 4  ;;  %s117_s22 = int_to_ptr.vmem [resolvable:$true] %s116_s22 }
  0x10   :  { %v102_v37 = vperm.slane %v100_v32, 0  ;;  %v103_v49 = vperm.slane %v101_v45, 0 }
  0x13   :  { %v141_v5 = vpop.eup %140 }
  0x14   :  { %v54_v6 = vmul.f32 32.0, %v141_v5  ;;  %vm58_vm1 = vweird.f32 %v141_v5 }
  0x16   :  { %51 = vadd.xlane.f32.xlu0 %v50_v3  ;;  %v55_v7 = vsub.f32 1.0, %v54_v6 }
  0x18   :  { %v56_v8 = vmul.f32 %v141_v5, %v55_v7 }
  0x1a   :  { %v57_v9 = vadd.f32 %v141_v5, %v56_v8 }
  0x1c   :  { %v59_v10 = vsel %vm58_vm1, %v141_v5, %v57_v9 }
  0x81   :  { %v49_v11 = vpop.xlane.xlu0 %48 }
  0x82   :  { %v60_v12 = vmul.f32 %v59_v10, %v49_v11 }
  0x84   :  { %v62_v13 = vsub.f32 %v44_v0, %v60_v12 }
  0x86   :  { %v64_v14 = vmul.f32 %v62_v13, %v62_v13 }
  0x88   :  { %v66_v15 = vsel %vm46_vm0, %v64_v14, 0.0 }
  0x89   :  { %67 = vadd.xlane.f32.xlu1 %v66_v15  ;;  %v52_v16 = vpop.xlane.xlu0 %51 }
  0x8a   :  { %v61_v17 = vmul.f32 %v59_v10, %v52_v16 }
  0x8c   :  { %v63_v18 = vsub.f32 %v45_v2, %v61_v17 }
  0x8e   :  { %v65_v19 = vmul.f32 %v63_v18, %v63_v18 }
  0x90   :  { %v69_v20 = vsel %vm46_vm0, %v65_v19, 0.0 }
  0x91   :  { %70 = vadd.xlane.f32.xlu1 %v69_v20 }
  0xfc   :  { %v68_v21 = vpop.xlane.xlu1 %67 }
  0xfd   :  { %v72_v22 = vmul.f32 %v68_v21, %v59_v10 }
  0xff   :  { %v74_v23 = vadd.f32 1e-06, %v72_v22 }
 0x101   :  { %142 = vrsqrt.f32 %v74_v23  ;;  %vm82_vm3 = vweird.f32 %v74_v23 }
 0x104   :  { %v71_v24 = vpop.xlane.xlu1 %70 }
 0x105   :  { %v73_v25 = vmul.f32 %v71_v24, %v59_v10 }
 0x107   :  { %v143_v26 = vpop.eup %142  ;;  %v75_v27 = vadd.f32 1e-06, %v73_v25 }
 0x108   :  { %v77_v28 = vmul.f32 %v143_v26, %v74_v23  ;;  %vm83_vm2 = vweird.f32 %v143_v26 }
 0x109   :  { %144 = vrsqrt.f32 %v75_v27  ;;  %vm84_vm4 = vmor %vm82_vm3, %vm83_vm2  ;;  %vm92_vm6 = vweird.f32 %v75_v27 }
 0x10a   :  { %v78_v30 = vmul.f32 %v143_v26, %v77_v28 }
 0x10c   :  { %v79_v31 = vmul.f32 0.5, %v78_v30 }
 0x10e   :  { %v80_v33 = vsub.f32 1.5, %v79_v31 }
 0x10f   :  { %v145_v34 = vpop.eup %144 }
 0x110   :  { %v81_v35 = vmul.f32 %v143_v26, %v80_v33  ;;  %v87_v36 = vmul.f32 %v145_v34, %v75_v27  ;;  %vm93_vm5 = vweird.f32 %v145_v34 }
 0x111   :  { %vm94_vm7 = vmor %vm92_vm6, %vm93_vm5 }
 0x112   :  { %v85_v38 = vsel %vm84_vm4, %v143_v26, %v81_v35  ;;  %v88_v40 = vmul.f32 %v145_v34, %v87_v36 }
 0x113   :  { %v96_v41 = vmul.f32 %v85_v38, %v62_v13 }
 0x114   :  { %v89_v43 = vmul.f32 0.5, %v88_v40 }
 0x115   :  { %v104_v44 = vmul.f32 %v102_v37, %v96_v41 }
 0x116   :  { %v90_v46 = vsub.f32 1.5, %v89_v43 }
 0x117   :  { %v108_v47 = vadd.f32 %v106_v42, %v104_v44 }
 0x118   :  { %v91_v48 = vmul.f32 %v145_v34, %v90_v46 }
 0x119   :  { %110 = vst.msk [vmem:[#allocation7] sm:$0xff] %vm46_vm0, %v108_v47 }
 0x11a   :  { %v95_v50 = vsel %vm94_vm7, %v145_v34, %v91_v48 }
 0x11b   :  { %v97_v51 = vmul.f32 %v95_v50, %v63_v18 }
 0x11d   :  { %v105_v53 = vmul.f32 %v103_v49, %v97_v51 }
 0x11f   :  { %v109_v54 = vadd.f32 %v107_v52, %v105_v53 }
 0x121   :  { %111 = vst.msk [vmem:[#allocation7 + $0x8] sm:$0xff] %vm46_vm0, %v109_v54 }
 0x122   :  { %124 = dma.vmem_to_hbm [thread:$0]  %s117_s22, 256, %s119_s25, [#allocation4], %s225_s17, %s225_s17, %s226_s18  }
 0x123   :  { %222 = dma.done.wait [#allocation4], 256  }
 0x124   :  { %223 = vsyncadd [#allocation4], 4294967040 }
 0x125   :  { %129 = vsyncpa [#allocation3], 1 }
 0x126   :  { %130 = vsyncpa [#allocation6], 1 }
 0x127   :  { %131 = vsyncpa [#allocation4], 1 }

</bundles_post_ra>
